<compile_context>
chip_gen: v7x
topology: tpu7x:2x2x1
jax: 0.10.0
libtpu: 0.0.40
codegen_flags: <defaults>
</compile_context>

<pallas_src>
import functools

import jax
import jax.numpy as jnp
from jax.experimental import pallas as pl
from jax.experimental.pallas import tpu as pltpu


# ----------------------------------------------------------------------------
# Fused Pallas kernel: projections + flow-attention core + output projection
# ----------------------------------------------------------------------------

def _flow_attention_kernel(qin_ref, kin_ref, vin_ref,
                           wq_ref, bq_ref, wk_ref, bk_ref, wv_ref, bv_ref,
                           wo_ref, bo_ref, hm_ref, o_ref,
                           *, eps, n_heads, mm_dtype):
    f32 = jnp.float32
    Bb, L, Din = qin_ref.shape
    _, S, _ = kin_ref.shape
    Dm = wq_ref.shape[1]
    Dh = Dm // n_heads
    Dout = wo_ref.shape[1]

    def mm(a, b):
        # MXU matmul: (possibly) low-precision inputs, always f32 accumulation.
        return jnp.dot(a.astype(mm_dtype), b.astype(mm_dtype),
                       preferred_element_type=f32)

    # ---- fused Q/K/V projections on the flattened (Bb*rows, Din) slab -------
    q2 = jax.nn.sigmoid(mm(qin_ref[...].reshape(Bb * L, Din), wq_ref[...]) + bq_ref[...])
    k2 = jax.nn.sigmoid(mm(kin_ref[...].reshape(Bb * S, Din), wk_ref[...]) + bk_ref[...])
    v2 = mm(vin_ref[...].reshape(Bb * S, Din), wv_ref[...]) + bv_ref[...]

    q = q2.reshape(Bb, L, Dm)          # f32, post-sigmoid feature map
    k = k2.reshape(Bb, S, Dm)
    v = v2.reshape(Bb, S, Dm)

    hm = hm_ref[...]                   # (Dm, Dm) 0/1 block-diagonal head mask

    def head_rep(x3):
        # Per-head sum over the Dh features of each head, replicated back over
        # all Dm lanes: a single f32 matmul against the block-diagonal mask.
        # (reciprocal / sigmoid / clip / softmax all commute with the 0/1
        #  replication, so downstream stats stay lane-dense at (rows, Dm).)
        rows = x3.shape[0] * x3.shape[1]
        return jnp.dot(x3.reshape(rows, Dm), hm,
                       preferred_element_type=f32).reshape(x3.shape)

    # ---- flow-attention statistics (f32, lane-replicated) -------------------
    k_sum = jnp.sum(k, axis=1, keepdims=True)                       # (Bb, 1, Dm)
    q_sum = jnp.sum(q, axis=1, keepdims=True)                       # (Bb, 1, Dm)

    sink_b = pl.reciprocal(head_rep((q + eps) * (k_sum + eps)), approx=True)  # (Bb,L,Dm)
    src_b = pl.reciprocal(head_rep((k + eps) * (q_sum + eps)), approx=True)   # (Bb,S,Dm)

    k_weighted = jnp.sum(k * src_b, axis=1, keepdims=True)          # (Bb, 1, Dm)
    q_weighted = jnp.sum(q * sink_b, axis=1, keepdims=True)         # (Bb, 1, Dm)

    sink_alloc_b = jax.nn.sigmoid(
        head_rep((q + eps) * (k_weighted + eps)) * (float(L) / float(S)))      # (Bb,L,Dm)
    cons_src = jnp.clip(head_rep((k + eps) * (q_weighted + eps)), -1.0, 1.0)   # (Bb,S,Dm)

    # softmax over the S axis (torch dim=-1 of (B, H, S)), scaled by S
    cs_max = jnp.max(cons_src, axis=1, keepdims=True)
    ex = jnp.exp(cons_src - cs_max)
    competition_b = ex * pl.reciprocal(jnp.sum(ex, axis=1, keepdims=True),
                                       approx=True) * float(S)                 # (Bb,S,Dm)

    qs = q * sink_b                                                 # (Bb, L, Dm)
    vs = v * competition_b                                          # (Bb, S, Dm)

    # ---- per-head (q*sink) @ (k^T @ (v*competition)) -------------------------
    if Dh % 128 == 0 and n_heads > 1:
        # Wide heads: head-batched contraction avoids the H-fold MXU FLOP waste
        # of the masked full matmul.
        q4 = qs.reshape(Bb, L, n_heads, Dh)
        k4 = k.reshape(Bb, S, n_heads, Dh)
        vs4 = vs.reshape(Bb, S, n_heads, Dh)
        kv4 = jnp.einsum('bshd,bshe->bhde', k4.astype(mm_dtype), vs4.astype(mm_dtype),
                         preferred_element_type=f32)
        qkv = jnp.einsum('blhd,bhde->blhe', q4.astype(mm_dtype), kv4.astype(mm_dtype),
                         preferred_element_type=f32).reshape(Bb, L, Dm)
    else:
        # Narrow heads (Dh < 128): per-head matmuls would underfill the MXU
        # lanes, so do one full (Dm x Dm) contraction masked to its per-head
        # block-diagonal (no in-kernel reshape/transpose/relayout).
        kv = jnp.einsum('bsd,bse->bde', k.astype(mm_dtype), vs.astype(mm_dtype),
                        preferred_element_type=f32) * hm            # (Bb, Dm, Dm)
        qkv = jnp.einsum('bld,bde->ble', qs.astype(mm_dtype), kv.astype(mm_dtype),
                         preferred_element_type=f32)                # (Bb, L, Dm)

    x2 = (qkv * sink_alloc_b).reshape(Bb * L, Dm)

    # ---- output projection (dropout == identity in eval) ---------------------
    o_ref[...] = (mm(x2, wo_ref[...]) + bo_ref[...]).reshape(Bb, L, Dout)


# ----------------------------------------------------------------------------
# Wrapper: padding, batch blocking, BlockSpecs
# ----------------------------------------------------------------------------

def flow_attention_forward(queries, keys, values, params, *, n_heads, eps,
                           mm_dtype=jnp.bfloat16, batch_block=None,
                           vmem_budget_bytes=24 * 1024 * 1024):
    """queries: (B, L, Din), keys/values: (B, S, Din) -> (B, L, Dout)."""
    B, L, Din = queries.shape
    _, S, _ = keys.shape
    Dm = params["wq"].shape[1]
    Dout = params["wo"].shape[1]
    Dh = Dm // n_heads

    # Lane-dense output: pad the output-projection columns to a multiple of 128
    # (zero weights / zero bias), slice back after the pallas_call.  Dm is NOT
    # padded: extra feature columns would change the per-head flow statistics.
    Dout_pad = max(128, ((Dout + 127) // 128) * 128)
    if Dout_pad != Dout:
        wo = jnp.zeros((Dm, Dout_pad), jnp.float32).at[:, :Dout].set(params["wo"])
        bo = jnp.zeros((1, Dout_pad), jnp.float32).at[:, :Dout].set(params["bo"])
    else:
        wo, bo = params["wo"], params["bo"]

    # Block-diagonal per-head indicator, built once on the host; constant
    # index_map keeps it VMEM-resident across the grid (never rebuilt in-kernel).
    head_ids = jnp.arange(Dm, dtype=jnp.int32) // Dh
    head_mask = (head_ids[:, None] == head_ids[None, :]).astype(jnp.float32)

    # Fuse several batch elements per grid step (fills MXU rows, amortizes the
    # ~0.35us / ~600-cycle per-step overhead) while staying under a VMEM budget.
    if batch_block is None:
        def footprint(bb):
            rows = bb * max(L, S)
            live = 14 * rows * Dm * 4 + bb * Dm * Dm * 4                 # intermediates + kv
            io = 2 * 4 * bb * (L * Din + 2 * S * Din + L * Dout_pad)      # double-buffered slabs
            w = 4 * (3 * Din * Dm + Dm * Dout_pad + Dm * Dm + 4 * Dm + Dout_pad)
            return live + io + w
        batch_block = 1
        for bb in range(B, 0, -1):
            if B % bb == 0 and footprint(bb) <= vmem_budget_bytes:
                batch_block = bb
                break

    kernel = functools.partial(_flow_attention_kernel,
                               eps=eps, n_heads=n_heads, mm_dtype=mm_dtype)

    const2d = lambda b: (0, 0)
    out = pl.pallas_call(
        kernel,
        out_shape=jax.ShapeDtypeStruct((B, L, Dout_pad), jnp.float32),
        grid=(B // batch_block,),
        in_specs=[
            pl.BlockSpec((batch_block, L, Din), lambda b: (b, 0, 0)),   # queries
            pl.BlockSpec((batch_block, S, Din), lambda b: (b, 0, 0)),   # keys
            pl.BlockSpec((batch_block, S, Din), lambda b: (b, 0, 0)),   # values
            pl.BlockSpec((Din, Dm), const2d),                           # wq
            pl.BlockSpec((1, Dm), const2d),                             # bq
            pl.BlockSpec((Din, Dm), const2d),                           # wk
            pl.BlockSpec((1, Dm), const2d),                             # bk
            pl.BlockSpec((Din, Dm), const2d),                           # wv
            pl.BlockSpec((1, Dm), const2d),                             # bv
            pl.BlockSpec((Dm, Dout_pad), const2d),                      # wo (padded)
            pl.BlockSpec((1, Dout_pad), const2d),                       # bo (padded)
            pl.BlockSpec((Dm, Dm), const2d),                            # head_mask
        ],
        out_specs=pl.BlockSpec((batch_block, L, Dout_pad), lambda b: (b, 0, 0)),
        compiler_params=pltpu.CompilerParams(
            dimension_semantics=("parallel",),
            # v7x has only 64 MiB VMEM (32 MiB default scoped limit); v5e's
            # default scoped limit is just 16 MiB — raise it explicitly.
            vmem_limit_bytes=48 * 1024 * 1024),
    )(queries, keys, values,
      params["wq"], params["bq"], params["wk"], params["bk"],
      params["wv"], params["bv"], wo, bo, head_mask)

    return out[:, :, :Dout] if Dout_pad != Dout else out


# ----------------------------------------------------------------------------
# Module wrapper (parameter setup in plain JAX)
# ----------------------------------------------------------------------------

class FlowAttentionPallas:
    def __init__(self, d_input, d_model, d_output, n_heads, eps=0.0005, seed=0,
                 matmul_dtype=jnp.bfloat16):
        self.n_heads = n_heads
        self.d_model = d_model
        self.eps = eps
        self.matmul_dtype = matmul_dtype
        key = jax.random.PRNGKey(seed)
        ks = jax.random.split(key, 8)
        s_in = 1.0 / jnp.sqrt(d_input)
        s_mid = 1.0 / jnp.sqrt(d_model)
        u = jax.random.uniform
        # weights stored as (in, out) so y = x @ W + b ; biases stored as (1, out)
        self.params = {
            "wq": u(ks[0], (d_input, d_model), jnp.float32, -s_in, s_in),
            "bq": u(ks[1], (1, d_model), jnp.float32, -s_in, s_in),
            "wk": u(ks[2], (d_input, d_model), jnp.float32, -s_in, s_in),
            "bk": u(ks[3], (1, d_model), jnp.float32, -s_in, s_in),
            "wv": u(ks[4], (d_input, d_model), jnp.float32, -s_in, s_in),
            "bv": u(ks[5], (1, d_model), jnp.float32, -s_in, s_in),
            "wo": u(ks[6], (d_model, d_output), jnp.float32, -s_mid, s_mid),
            "bo": u(ks[7], (1, d_output), jnp.float32, -s_mid, s_mid),
        }

    def __call__(self, queries, keys, values):
        return flow_attention_forward(queries, keys, values, self.params,
                                      n_heads=self.n_heads, eps=self.eps,
                                      mm_dtype=self.matmul_dtype)


# ----------------------------------------------------------------------------
# Pure-JAX reference (mirror of the PyTorch module) for validation
# ----------------------------------------------------------------------------

def _reference_forward(queries, keys, values, p, n_heads, eps):
    B, L, _ = queries.shape
    _, S, _ = keys.shape
    Dm = p["wq"].shape[1]
    Dh = Dm // n_heads
    q = queries @ p["wq"] + p["bq"]
    k = keys @ p["wk"] + p["bk"]
    v = values @ p["wv"] + p["bv"]
    q = q.reshape(B, L, n_heads, Dh).transpose(0, 2, 1, 3)
    k = k.reshape(B, S, n_heads, Dh).transpose(0, 2, 1, 3)
    v = v.reshape(B, S, n_heads, Dh).transpose(0, 2, 1, 3)
    q = jax.nn.sigmoid(q)
    k = jax.nn.sigmoid(k)
    sink_incoming = 1.0 / jnp.einsum('nhld,nhd->nhl', q + eps, k.sum(axis=2) + eps)
    source_outgoing = 1.0 / jnp.einsum('nhld,nhd->nhl', k + eps, q.sum(axis=2) + eps)
    conserved_sink = jnp.einsum('nhld,nhd->nhl', q + eps,
                                (k * source_outgoing[..., None]).sum(axis=2) + eps)
    conserved_source = jnp.einsum('nhld,nhd->nhl', k + eps,
                                  (q * sink_incoming[..., None]).sum(axis=2) + eps)
    conserved_source = jnp.clip(conserved_source, -1.0, 1.0)
    sink_allocation = jax.nn.sigmoid(conserved_sink * (float(L) / float(S)))
    source_competition = jax.nn.softmax(conserved_source, axis=-1) * float(S)
    kv = jnp.einsum('nhld,nhlm->nhdm', k, v * source_competition[..., None])
    x = jnp.einsum('nhld,nhdm->nhlm', q * sink_incoming[..., None], kv)
    x = x * sink_allocation[..., None]
    x = x.transpose(0, 2, 1, 3).reshape(B, L, Dm)
    return x @ p["wo"] + p["bo"]


# ----------------------------------------------------------------------------
# Example run
# ----------------------------------------------------------------------------

if __name__ == "__main__":
    B, L, S = 2, 8, 8
    d_input, d_model, d_output, n_heads = 16, 32, 16, 4

    key = jax.random.PRNGKey(0)
    kq, kk, kv = jax.random.split(key, 3)
    queries = jax.random.normal(kq, (B, L, d_input), jnp.float32)
    keys = jax.random.normal(kk, (B, S, d_input), jnp.float32)
    values = jax.random.normal(kv, (B, S, d_input), jnp.float32)

    # Default module: bf16 matmul inputs / f32 accumulate (v6e/v7x-oriented).
    module = FlowAttentionPallas(d_input, d_model, d_output, n_heads)
    out = jax.block_until_ready(module(queries, keys, values))
    assert out.shape == (B, L, d_output), out.shape
    assert bool(jnp.all(jnp.isfinite(out)))

    ref = _reference_forward(queries, keys, values, module.params,
                             n_heads, module.eps)

    # f32-matmul variant: tight parity check (only EUP approx-reciprocal error).
    out_f32 = jax.block_until_ready(
        flow_attention_forward(queries, keys, values, module.params,
                               n_heads=n_heads, eps=module.eps,
                               mm_dtype=jnp.float32))
    assert bool(jnp.allclose(out_f32, ref, atol=1e-2, rtol=1e-2)), (
        float(jnp.max(jnp.abs(out_f32 - ref))))

    # bf16-matmul default: looser tolerance (bf16 inputs + approx reciprocals).
    assert bool(jnp.allclose(out, ref, atol=7e-2, rtol=7e-2)), (
        float(jnp.max(jnp.abs(out - ref))))

    print("KERNEL_OK")
</pallas_src>

<mosaic_0001>
module attributes {stable_mosaic.version = 11 : i64} {
  func.func @_flow_attention_kernel(%arg0: i32, %arg1: memref<2x8x16xf32, #tpu.memory_space<vmem>>, %arg2: memref<2x8x16xf32, #tpu.memory_space<vmem>>, %arg3: memref<2x8x16xf32, #tpu.memory_space<vmem>>, %arg4: memref<16x32xf32, #tpu.memory_space<vmem>>, %arg5: memref<1x32xf32, #tpu.memory_space<vmem>>, %arg6: memref<16x32xf32, #tpu.memory_space<vmem>>, %arg7: memref<1x32xf32, #tpu.memory_space<vmem>>, %arg8: memref<16x32xf32, #tpu.memory_space<vmem>>, %arg9: memref<1x32xf32, #tpu.memory_space<vmem>>, %arg10: memref<32x128xf32, #tpu.memory_space<vmem>>, %arg11: memref<1x128xf32, #tpu.memory_space<vmem>>, %arg12: memref<32x32xf32, #tpu.memory_space<vmem>>, %arg13: memref<2x8x128xf32, #tpu.memory_space<vmem>>) attributes {dimension_semantics = [#tpu.dimension_semantics<parallel>], iteration_bounds = array<i64: 1>, scalar_prefetch = 0 : i64, scratch_operands = 0 : i64, tpu.core_type = #tpu.core_type<tc>, window_params = [{transform_indices = @transform_0, window_bounds = array<i64: 2, 8, 16>}, {transform_indices = @transform_1, window_bounds = array<i64: 2, 8, 16>}, {transform_indices = @transform_2, window_bounds = array<i64: 2, 8, 16>}, {pipeline_mode = #tpu.pipeline_mode<synchronous>, transform_indices = @transform_3, window_bounds = array<i64: 16, 32>}, {pipeline_mode = #tpu.pipeline_mode<synchronous>, transform_indices = @transform_4, window_bounds = array<i64: 1, 32>}, {pipeline_mode = #tpu.pipeline_mode<synchronous>, transform_indices = @transform_5, window_bounds = array<i64: 16, 32>}, {pipeline_mode = #tpu.pipeline_mode<synchronous>, transform_indices = @transform_6, window_bounds = array<i64: 1, 32>}, {pipeline_mode = #tpu.pipeline_mode<synchronous>, transform_indices = @transform_7, window_bounds = array<i64: 16, 32>}, {pipeline_mode = #tpu.pipeline_mode<synchronous>, transform_indices = @transform_8, window_bounds = array<i64: 1, 32>}, {pipeline_mode = #tpu.pipeline_mode<synchronous>, transform_indices = @transform_9, window_bounds = array<i64: 32, 128>}, {pipeline_mode = #tpu.pipeline_mode<synchronous>, transform_indices = @transform_10, window_bounds = array<i64: 1, 128>}, {pipeline_mode = #tpu.pipeline_mode<synchronous>, transform_indices = @transform_11, window_bounds = array<i64: 32, 32>}, {transform_indices = @transform_12, window_bounds = array<i64: 2, 8, 128>}]} {
    %c0 = arith.constant 0 : index
    %c0_0 = arith.constant 0 : index
    %c0_1 = arith.constant 0 : index
    %0 = vector.load %arg1[%c0, %c0_0, %c0_1] : memref<2x8x16xf32, #tpu.memory_space<vmem>>, vector<2x8x16xf32>
    %1 = vector.shape_cast %0 : vector<2x8x16xf32> to vector<16x16xf32>
    %c0_2 = arith.constant 0 : index
    %c0_3 = arith.constant 0 : index
    %2 = vector.load %arg4[%c0_2, %c0_3] : memref<16x32xf32, #tpu.memory_space<vmem>>, vector<16x32xf32>
    %3 = arith.truncf %1 : vector<16x16xf32> to vector<16x16xbf16>
    %4 = arith.truncf %2 : vector<16x32xf32> to vector<16x32xbf16>
    %cst = arith.constant dense<0.000000e+00> : vector<16x32xf32>
    %5 = tpu.matmul %3, %4, %cst {dimension_numbers = #tpu.dot_dimension_numbers<[1], [0], [0], [1], [0, 0, 1, 1], [], []>} : vector<16x16xbf16>, vector<16x32xbf16>, vector<16x32xf32> -> vector<16x32xf32>
    %c0_4 = arith.constant 0 : index
    %c0_5 = arith.constant 0 : index
    %6 = vector.load %arg5[%c0_4, %c0_5] : memref<1x32xf32, #tpu.memory_space<vmem>>, vector<1x32xf32>
    %7 = vector.broadcast %6 : vector<1x32xf32> to vector<16x32xf32>
    %8 = arith.addf %5, %7 : vector<16x32xf32>
    %9 = arith.negf %8 : vector<16x32xf32>
    %10 = math.exp %9 : vector<16x32xf32>
    %cst_6 = arith.constant 1.000000e+00 : f32
    %11 = vector.broadcast %cst_6 : f32 to vector<16x32xf32>
    %12 = arith.addf %11, %10 : vector<16x32xf32>
    %13 = arith.divf %11, %12 : vector<16x32xf32>
    %c0_7 = arith.constant 0 : index
    %c0_8 = arith.constant 0 : index
    %c0_9 = arith.constant 0 : index
    %14 = vector.load %arg2[%c0_7, %c0_8, %c0_9] : memref<2x8x16xf32, #tpu.memory_space<vmem>>, vector<2x8x16xf32>
    %15 = vector.shape_cast %14 : vector<2x8x16xf32> to vector<16x16xf32>
    %c0_10 = arith.constant 0 : index
    %c0_11 = arith.constant 0 : index
    %16 = vector.load %arg6[%c0_10, %c0_11] : memref<16x32xf32, #tpu.memory_space<vmem>>, vector<16x32xf32>
    %17 = arith.truncf %15 : vector<16x16xf32> to vector<16x16xbf16>
    %18 = arith.truncf %16 : vector<16x32xf32> to vector<16x32xbf16>
    %cst_12 = arith.constant dense<0.000000e+00> : vector<16x32xf32>
    %19 = tpu.matmul %17, %18, %cst_12 {dimension_numbers = #tpu.dot_dimension_numbers<[1], [0], [0], [1], [0, 0, 1, 1], [], []>} : vector<16x16xbf16>, vector<16x32xbf16>, vector<16x32xf32> -> vector<16x32xf32>
    %c0_13 = arith.constant 0 : index
    %c0_14 = arith.constant 0 : index
    %20 = vector.load %arg7[%c0_13, %c0_14] : memref<1x32xf32, #tpu.memory_space<vmem>>, vector<1x32xf32>
    %21 = vector.broadcast %20 : vector<1x32xf32> to vector<16x32xf32>
    %22 = arith.addf %19, %21 : vector<16x32xf32>
    %23 = arith.negf %22 : vector<16x32xf32>
    %24 = math.exp %23 : vector<16x32xf32>
    %cst_15 = arith.constant 1.000000e+00 : f32
    %25 = vector.broadcast %cst_15 : f32 to vector<16x32xf32>
    %26 = arith.addf %25, %24 : vector<16x32xf32>
    %27 = arith.divf %25, %26 : vector<16x32xf32>
    %c0_16 = arith.constant 0 : index
    %c0_17 = arith.constant 0 : index
    %c0_18 = arith.constant 0 : index
    %28 = vector.load %arg3[%c0_16, %c0_17, %c0_18] : memref<2x8x16xf32, #tpu.memory_space<vmem>>, vector<2x8x16xf32>
    %29 = vector.shape_cast %28 : vector<2x8x16xf32> to vector<16x16xf32>
    %c0_19 = arith.constant 0 : index
    %c0_20 = arith.constant 0 : index
    %30 = vector.load %arg8[%c0_19, %c0_20] : memref<16x32xf32, #tpu.memory_space<vmem>>, vector<16x32xf32>
    %31 = arith.truncf %29 : vector<16x16xf32> to vector<16x16xbf16>
    %32 = arith.truncf %30 : vector<16x32xf32> to vector<16x32xbf16>
    %cst_21 = arith.constant dense<0.000000e+00> : vector<16x32xf32>
    %33 = tpu.matmul %31, %32, %cst_21 {dimension_numbers = #tpu.dot_dimension_numbers<[1], [0], [0], [1], [0, 0, 1, 1], [], []>} : vector<16x16xbf16>, vector<16x32xbf16>, vector<16x32xf32> -> vector<16x32xf32>
    %c0_22 = arith.constant 0 : index
    %c0_23 = arith.constant 0 : index
    %34 = vector.load %arg9[%c0_22, %c0_23] : memref<1x32xf32, #tpu.memory_space<vmem>>, vector<1x32xf32>
    %35 = vector.broadcast %34 : vector<1x32xf32> to vector<16x32xf32>
    %36 = arith.addf %33, %35 : vector<16x32xf32>
    %37 = vector.shape_cast %13 : vector<16x32xf32> to vector<2x8x32xf32>
    %38 = vector.shape_cast %27 : vector<16x32xf32> to vector<2x8x32xf32>
    %39 = vector.shape_cast %36 : vector<16x32xf32> to vector<2x8x32xf32>
    %c0_24 = arith.constant 0 : index
    %c0_25 = arith.constant 0 : index
    %40 = vector.load %arg12[%c0_24, %c0_25] : memref<32x32xf32, #tpu.memory_space<vmem>>, vector<32x32xf32>
    %cst_26 = arith.constant dense<0.000000e+00> : vector<2x32xf32>
    %41 = vector.multi_reduction <add>, %38, %cst_26 [1] : vector<2x8x32xf32> to vector<2x32xf32>
    %42 = vector.shape_cast %41 : vector<2x32xf32> to vector<2x1x32xf32>
    %cst_27 = arith.constant dense<0.000000e+00> : vector<2x32xf32>
    %43 = vector.multi_reduction <add>, %37, %cst_27 [1] : vector<2x8x32xf32> to vector<2x32xf32>
    %44 = vector.shape_cast %43 : vector<2x32xf32> to vector<2x1x32xf32>
    %cst_28 = arith.constant 5.000000e-04 : f32
    %45 = vector.broadcast %cst_28 : f32 to vector<2x8x32xf32>
    %46 = arith.addf %37, %45 : vector<2x8x32xf32>
    %cst_29 = arith.constant 5.000000e-04 : f32
    %47 = vector.broadcast %cst_29 : f32 to vector<2x1x32xf32>
    %48 = arith.addf %42, %47 : vector<2x1x32xf32>
    %49 = vector.broadcast %48 : vector<2x1x32xf32> to vector<2x8x32xf32>
    %50 = arith.mulf %46, %49 : vector<2x8x32xf32>
    %51 = vector.shape_cast %50 : vector<2x8x32xf32> to vector<16x32xf32>
    %cst_30 = arith.constant dense<0.000000e+00> : vector<16x32xf32>
    %52 = tpu.matmul %51, %40, %cst_30 {dimension_numbers = #tpu.dot_dimension_numbers<[1], [0], [0], [1], [0, 0, 1, 1], [], []>} : vector<16x32xf32>, vector<32x32xf32>, vector<16x32xf32> -> vector<16x32xf32>
    %53 = vector.shape_cast %52 : vector<16x32xf32> to vector<2x8x32xf32>
    %54 = tpu.reciprocal %53 {approx = true} : vector<2x8x32xf32> -> vector<2x8x32xf32>
    %cst_31 = arith.constant 5.000000e-04 : f32
    %55 = vector.broadcast %cst_31 : f32 to vector<2x8x32xf32>
    %56 = arith.addf %38, %55 : vector<2x8x32xf32>
    %cst_32 = arith.constant 5.000000e-04 : f32
    %57 = vector.broadcast %cst_32 : f32 to vector<2x1x32xf32>
    %58 = arith.addf %44, %57 : vector<2x1x32xf32>
    %59 = vector.broadcast %58 : vector<2x1x32xf32> to vector<2x8x32xf32>
    %60 = arith.mulf %56, %59 : vector<2x8x32xf32>
    %61 = vector.shape_cast %60 : vector<2x8x32xf32> to vector<16x32xf32>
    %cst_33 = arith.constant dense<0.000000e+00> : vector<16x32xf32>
    %62 = tpu.matmul %61, %40, %cst_33 {dimension_numbers = #tpu.dot_dimension_numbers<[1], [0], [0], [1], [0, 0, 1, 1], [], []>} : vector<16x32xf32>, vector<32x32xf32>, vector<16x32xf32> -> vector<16x32xf32>
    %63 = vector.shape_cast %62 : vector<16x32xf32> to vector<2x8x32xf32>
    %64 = tpu.reciprocal %63 {approx = true} : vector<2x8x32xf32> -> vector<2x8x32xf32>
    %65 = arith.mulf %38, %64 : vector<2x8x32xf32>
    %cst_34 = arith.constant dense<0.000000e+00> : vector<2x32xf32>
    %66 = vector.multi_reduction <add>, %65, %cst_34 [1] : vector<2x8x32xf32> to vector<2x32xf32>
    %67 = vector.shape_cast %66 : vector<2x32xf32> to vector<2x1x32xf32>
    %68 = arith.mulf %37, %54 : vector<2x8x32xf32>
    %cst_35 = arith.constant dense<0.000000e+00> : vector<2x32xf32>
    %69 = vector.multi_reduction <add>, %68, %cst_35 [1] : vector<2x8x32xf32> to vector<2x32xf32>
    %70 = vector.shape_cast %69 : vector<2x32xf32> to vector<2x1x32xf32>
    %cst_36 = arith.constant 5.000000e-04 : f32
    %71 = vector.broadcast %cst_36 : f32 to vector<2x8x32xf32>
    %72 = arith.addf %37, %71 : vector<2x8x32xf32>
    %cst_37 = arith.constant 5.000000e-04 : f32
    %73 = vector.broadcast %cst_37 : f32 to vector<2x1x32xf32>
    %74 = arith.addf %67, %73 : vector<2x1x32xf32>
    %75 = vector.broadcast %74 : vector<2x1x32xf32> to vector<2x8x32xf32>
    %76 = arith.mulf %72, %75 : vector<2x8x32xf32>
    %77 = vector.shape_cast %76 : vector<2x8x32xf32> to vector<16x32xf32>
    %cst_38 = arith.constant dense<0.000000e+00> : vector<16x32xf32>
    %78 = tpu.matmul %77, %40, %cst_38 {dimension_numbers = #tpu.dot_dimension_numbers<[1], [0], [0], [1], [0, 0, 1, 1], [], []>} : vector<16x32xf32>, vector<32x32xf32>, vector<16x32xf32> -> vector<16x32xf32>
    %79 = vector.shape_cast %78 : vector<16x32xf32> to vector<2x8x32xf32>
    %cst_39 = arith.constant 1.000000e+00 : f32
    %80 = vector.broadcast %cst_39 : f32 to vector<2x8x32xf32>
    %81 = arith.mulf %79, %80 : vector<2x8x32xf32>
    %82 = arith.negf %81 : vector<2x8x32xf32>
    %83 = math.exp %82 : vector<2x8x32xf32>
    %cst_40 = arith.constant 1.000000e+00 : f32
    %84 = vector.broadcast %cst_40 : f32 to vector<2x8x32xf32>
    %85 = arith.addf %84, %83 : vector<2x8x32xf32>
    %86 = arith.divf %84, %85 : vector<2x8x32xf32>
    %cst_41 = arith.constant 5.000000e-04 : f32
    %87 = vector.broadcast %cst_41 : f32 to vector<2x8x32xf32>
    %88 = arith.addf %38, %87 : vector<2x8x32xf32>
    %cst_42 = arith.constant 5.000000e-04 : f32
    %89 = vector.broadcast %cst_42 : f32 to vector<2x1x32xf32>
    %90 = arith.addf %70, %89 : vector<2x1x32xf32>
    %91 = vector.broadcast %90 : vector<2x1x32xf32> to vector<2x8x32xf32>
    %92 = arith.mulf %88, %91 : vector<2x8x32xf32>
    %93 = vector.shape_cast %92 : vector<2x8x32xf32> to vector<16x32xf32>
    %cst_43 = arith.constant dense<0.000000e+00> : vector<16x32xf32>
    %94 = tpu.matmul %93, %40, %cst_43 {dimension_numbers = #tpu.dot_dimension_numbers<[1], [0], [0], [1], [0, 0, 1, 1], [], []>} : vector<16x32xf32>, vector<32x32xf32>, vector<16x32xf32> -> vector<16x32xf32>
    %95 = vector.shape_cast %94 : vector<16x32xf32> to vector<2x8x32xf32>
    %cst_44 = arith.constant -1.000000e+00 : f32
    %cst_45 = arith.constant 1.000000e+00 : f32
    %96 = vector.broadcast %cst_44 : f32 to vector<2x8x32xf32>
    %97 = arith.maximumf %96, %95 : vector<2x8x32xf32>
    %98 = vector.broadcast %cst_45 : f32 to vector<2x8x32xf32>
    %99 = arith.minimumf %98, %97 : vector<2x8x32xf32>
    %cst_46 = arith.constant dense<0xFF800000> : vector<2x32xf32>
    %100 = vector.multi_reduction <maximumf>, %99, %cst_46 [1] : vector<2x8x32xf32> to vector<2x32xf32>
    %101 = vector.shape_cast %100 : vector<2x32xf32> to vector<2x1x32xf32>
    %102 = vector.broadcast %101 : vector<2x1x32xf32> to vector<2x8x32xf32>
    %103 = arith.subf %99, %102 : vector<2x8x32xf32>
    %104 = math.exp %103 : vector<2x8x32xf32>
    %cst_47 = arith.constant dense<0.000000e+00> : vector<2x32xf32>
    %105 = vector.multi_reduction <add>, %104, %cst_47 [1] : vector<2x8x32xf32> to vector<2x32xf32>
    %106 = vector.shape_cast %105 : vector<2x32xf32> to vector<2x1x32xf32>
    %107 = tpu.reciprocal %106 {approx = true} : vector<2x1x32xf32> -> vector<2x1x32xf32>
    %108 = vector.broadcast %107 : vector<2x1x32xf32> to vector<2x8x32xf32>
    %109 = arith.mulf %104, %108 : vector<2x8x32xf32>
    %cst_48 = arith.constant 8.000000e+00 : f32
    %110 = vector.broadcast %cst_48 : f32 to vector<2x8x32xf32>
    %111 = arith.mulf %109, %110 : vector<2x8x32xf32>
    %112 = arith.mulf %37, %54 : vector<2x8x32xf32>
    %113 = arith.mulf %39, %111 : vector<2x8x32xf32>
    %114 = arith.truncf %38 : vector<2x8x32xf32> to vector<2x8x32xbf16>
    %115 = arith.truncf %113 : vector<2x8x32xf32> to vector<2x8x32xbf16>
    "tpu.trace_start"() <{level = 10 : i32, message = "bsd,bse->bde"}> : () -> ()
    %cst_49 = arith.constant dense<0.000000e+00> : vector<2x32x32xf32>
    %116 = tpu.matmul %114, %115, %cst_49 {dimension_numbers = #tpu.dot_dimension_numbers<[1], [1], [2], [2], [0, 0, 0, 2, 1, 2], [0], [0]>} : vector<2x8x32xbf16>, vector<2x8x32xbf16>, vector<2x32x32xf32> -> vector<2x32x32xf32>
    "tpu.trace_stop"() : () -> ()
    %117 = vector.shape_cast %40 : vector<32x32xf32> to vector<1x32x32xf32>
    %118 = vector.broadcast %117 : vector<1x32x32xf32> to vector<2x32x32xf32>
    %119 = arith.mulf %116, %118 : vector<2x32x32xf32>
    %120 = arith.truncf %112 : vector<2x8x32xf32> to vector<2x8x32xbf16>
    %121 = arith.truncf %119 : vector<2x32x32xf32> to vector<2x32x32xbf16>
    "tpu.trace_start"() <{level = 10 : i32, message = "bld,bde->ble"}> : () -> ()
    %cst_50 = arith.constant dense<0.000000e+00> : vector<2x8x32xf32>
    %122 = tpu.matmul %120, %121, %cst_50 {dimension_numbers = #tpu.dot_dimension_numbers<[2], [1], [1], [2], [0, 0, 0, 1, 1, 2], [0], [0]>} : vector<2x8x32xbf16>, vector<2x32x32xbf16>, vector<2x8x32xf32> -> vector<2x8x32xf32>
    "tpu.trace_stop"() : () -> ()
    %123 = arith.mulf %122, %86 : vector<2x8x32xf32>
    %124 = vector.shape_cast %123 : vector<2x8x32xf32> to vector<16x32xf32>
    %c0_51 = arith.constant 0 : index
    %c0_52 = arith.constant 0 : index
    %125 = vector.load %arg10[%c0_51, %c0_52] : memref<32x128xf32, #tpu.memory_space<vmem>>, vector<32x128xf32>
    %126 = arith.truncf %124 : vector<16x32xf32> to vector<16x32xbf16>
    %127 = arith.truncf %125 : vector<32x128xf32> to vector<32x128xbf16>
    %cst_53 = arith.constant dense<0.000000e+00> : vector<16x128xf32>
    %128 = tpu.matmul %126, %127, %cst_53 {dimension_numbers = #tpu.dot_dimension_numbers<[1], [0], [0], [1], [0, 0, 1, 1], [], []>} : vector<16x32xbf16>, vector<32x128xbf16>, vector<16x128xf32> -> vector<16x128xf32>
    %c0_54 = arith.constant 0 : index
    %c0_55 = arith.constant 0 : index
    %129 = vector.load %arg11[%c0_54, %c0_55] : memref<1x128xf32, #tpu.memory_space<vmem>>, vector<1x128xf32>
    %130 = vector.broadcast %129 : vector<1x128xf32> to vector<16x128xf32>
    %131 = arith.addf %128, %130 : vector<16x128xf32>
    %132 = vector.shape_cast %131 : vector<16x128xf32> to vector<2x8x128xf32>
    %c0_56 = arith.constant 0 : index
    %c0_57 = arith.constant 0 : index
    %c0_58 = arith.constant 0 : index
    %133 = vector.load %arg13[%c0_56, %c0_57, %c0_58] : memref<2x8x128xf32, #tpu.memory_space<vmem>>, vector<2x8x128xf32>
    tpu.vector_store %arg13[%c0_56, %c0_57, %c0_58], %132 {strides = array<i32>} : memref<2x8x128xf32, #tpu.memory_space<vmem>>, vector<2x8x128xf32>,
    return
  }
  func.func @transform_0(%arg0: i32) -> (i32, i32, i32) {
    %c0_i32 = arith.constant 0 : i32
    %c0_i32_0 = arith.constant 0 : i32
    %c0_i32_1 = arith.constant 0 : i32
    return %arg0, %c0_i32, %c0_i32_0 : i32, i32, i32
  }
  func.func @transform_1(%arg0: i32) -> (i32, i32, i32) {
    %c0_i32 = arith.constant 0 : i32
    %c0_i32_0 = arith.constant 0 : i32
    %c0_i32_1 = arith.constant 0 : i32
    return %arg0, %c0_i32, %c0_i32_0 : i32, i32, i32
  }
  func.func @transform_2(%arg0: i32) -> (i32, i32, i32) {
    %c0_i32 = arith.constant 0 : i32
    %c0_i32_0 = arith.constant 0 : i32
    %c0_i32_1 = arith.constant 0 : i32
    return %arg0, %c0_i32, %c0_i32_0 : i32, i32, i32
  }
  func.func @transform_3(%arg0: i32) -> (i32, i32) {
    %c0_i32 = arith.constant 0 : i32
    %c0_i32_0 = arith.constant 0 : i32
    %c0_i32_1 = arith.constant 0 : i32
    return %c0_i32, %c0_i32_0 : i32, i32
  }
  func.func @transform_4(%arg0: i32) -> (i32, i32) {
    %c0_i32 = arith.constant 0 : i32
    %c0_i32_0 = arith.constant 0 : i32
    %c0_i32_1 = arith.constant 0 : i32
    return %c0_i32, %c0_i32_0 : i32, i32
  }
  func.func @transform_5(%arg0: i32) -> (i32, i32) {
    %c0_i32 = arith.constant 0 : i32
    %c0_i32_0 = arith.constant 0 : i32
    %c0_i32_1 = arith.constant 0 : i32
    return %c0_i32, %c0_i32_0 : i32, i32
  }
  func.func @transform_6(%arg0: i32) -> (i32, i32) {
    %c0_i32 = arith.constant 0 : i32
    %c0_i32_0 = arith.constant 0 : i32
    %c0_i32_1 = arith.constant 0 : i32
    return %c0_i32, %c0_i32_0 : i32, i32
  }
  func.func @transform_7(%arg0: i32) -> (i32, i32) {
    %c0_i32 = arith.constant 0 : i32
    %c0_i32_0 = arith.constant 0 : i32
    %c0_i32_1 = arith.constant 0 : i32
    return %c0_i32, %c0_i32_0 : i32, i32
  }
  func.func @transform_8(%arg0: i32) -> (i32, i32) {
    %c0_i32 = arith.constant 0 : i32
    %c0_i32_0 = arith.constant 0 : i32
    %c0_i32_1 = arith.constant 0 : i32
    return %c0_i32, %c0_i32_0 : i32, i32
  }
  func.func @transform_9(%arg0: i32) -> (i32, i32) {
    %c0_i32 = arith.constant 0 : i32
    %c0_i32_0 = arith.constant 0 : i32
    %c0_i32_1 = arith.constant 0 : i32
    return %c0_i32, %c0_i32_0 : i32, i32
  }
  func.func @transform_10(%arg0: i32) -> (i32, i32) {
    %c0_i32 = arith.constant 0 : i32
    %c0_i32_0 = arith.constant 0 : i32
    %c0_i32_1 = arith.constant 0 : i32
    return %c0_i32, %c0_i32_0 : i32, i32
  }
  func.func @transform_11(%arg0: i32) -> (i32, i32) {
    %c0_i32 = arith.constant 0 : i32
    %c0_i32_0 = arith.constant 0 : i32
    %c0_i32_1 = arith.constant 0 : i32
    return %c0_i32, %c0_i32_0 : i32, i32
  }
  func.func @transform_12(%arg0: i32) -> (i32, i32, i32) {
    %c0_i32 = arith.constant 0 : i32
    %c0_i32_0 = arith.constant 0 : i32
    %c0_i32_1 = arith.constant 0 : i32
    return %arg0, %c0_i32, %c0_i32_0 : i32, i32, i32
  }
}

</mosaic_0001>

<bundles_post_ra>
// kernel: tpu_custom_call.1
= control target key start
LH: loop header
LB: loop body
LE: loop exit
PB: predicated region body
PF: predicated region fallthrough
CT: control target
= control target key end

     0   :  { %17 = vsyncpa [#allocation3], 0  ;;  %s2040_s0 = inlined_call_operand.hbm [shape: f32[2,8,16], index: 0, kind: input, shape index: {}]   ;;  %s2041_s1 = inlined_call_operand.hbm [shape: f32[2,8,16], index: 1, kind: input, shape index: {}]   ;;  %s2042_s2 = inlined_call_operand.hbm [shape: f32[2,8,16], index: 2, kind: input, shape index: {}]   ;;  %s2043_s3 = inlined_call_operand.hbm [shape: f32[16,32], index: 3, kind: input, shape index: {}]   ;;  %s2044_s4 = inlined_call_operand.vmem [shape: f32[1,32], index: 4, kind: input, shape index: {}]   ;;  %s2045_s5 = inlined_call_operand.hbm [shape: f32[16,32], index: 5, kind: input, shape index: {}]   ;;  %s2046_s6 = inlined_call_operand.vmem [shape: f32[1,32], index: 6, kind: input, shape index: {}]   ;;  %s2047_s7 = inlined_call_operand.hbm [shape: f32[16,32], index: 7, kind: input, shape index: {}]   ;;  %s2048_s8 = inlined_call_operand.hbm [shape: f32[1,32], index: 8, kind: input, shape index: {}]   ;;  %s2049_s9 = inlined_call_operand.vmem [shape: f32[32,128], index: 9, kind: input, shape index: {}]   ;;  %s2050_s10 = inlined_call_operand.vmem [shape: f32[1,128], index: 10, kind: input, shape index: {}]   ;;  %s2051_s11 = inlined_call_operand.hbm [shape: f32[32,32], index: 11, kind: input, shape index: {}]   ;;  %s2052_s12 = inlined_call_operand.hbm [shape: f32[2,8,128], index: 12, kind: output, shape index: {}]  }
   0x1   :  { %18 = vsyncpa [#allocation6], 0 }
   0x2   :  { %19 = vsyncpa [#allocation9], 0 }
   0x3   :  { %20 = vsyncpa [#allocation12], 0 }
   0x4   :  { %21 = vsyncpa [#allocation15], 0 }
   0x5   :  { %22 = vsyncpa [#allocation4], 0  ;;  %s1625_s21 = smov [#allocation5]   ;;  %s1626_s23 = smov [#allocation8]  }
   0x6   :  { %s40_s22 = sshll.u32 %s1625_s21, 4  ;;  %s64_s24 = sshll.u32 %s1626_s23, 4  ;;  %s41_s22 = int_to_ptr.vmem [resolvable:$true] %s40_s22  ;;  %s1703_s24 = int_to_ptr.vmem [resolvable:$true] %s64_s24 }
   0x7   :  { %s1415_s27 = scalar_lea.hbm %s2041_s1, 256 }
   0x8   :  { %p1416_p0 = scmp.ne.s32.totalorder %s2041_s1, %s1415_s27  ;;  %p1419_p1 = scmp.lt.u32.totalorder %s1415_s27, %s2041_s1 }
   0xa   :  { %p1421_p2 = pnand %p1419_p1, %p1416_p0 }
   0xc   :  { %1424 = shalt.err (!%p1421_p2)
}
   0xd   :  { %s1425_s14 = scalar_lea.vmem %s41_s22, 256  ;;  %p1430_p4 = scmp.lt.s32.totalorder %s41_s22, %s41_s22 }
   0xe   :  { %p1426_p3 = scmp.ne.s32.totalorder %s41_s22, %s1425_s14  ;;  %p1431_p5 = scmp.lt.s32.totalorder %s1425_s14, %s1425_s14 }
  0x10   :  { %p1432_p6 = por %p1431_p5, %p1430_p4 }
  0x12   :  { %p1433_p7 = pnand %p1432_p6, %p1426_p3 }
  0x14   :  { %1436 = shalt.err (!%p1433_p7)
}
  0x15   :  { %s1627_s15 = smov 128   ;;  %s1628_s16 = smov 8  }
  0x16   :  { %46 = dma.hbm_to_vmem [thread:$0]  %s2041_s1, 256, %s41_s22, [#allocation6], %s1627_s15, %s1627_s15, %s1628_s16  }
  0x17   :  { %s1437_s21 = scalar_lea.hbm %s2043_s3, 256 }
  0x18   :  { %p1438_p8 = scmp.ne.s32.totalorder %s2043_s3, %s1437_s21  ;;  %p1441_p9 = scmp.lt.u32.totalorder %s1437_s21, %s2043_s3 }
  0x1a   :  { %p1443_p10 = pnand %p1441_p9, %p1438_p8 }
  0x1c   :  { %1446 = shalt.err (!%p1443_p10)
}
  0x1d   :  { %s1447_s28 = scalar_lea.vmem %s1703_s24, 256  ;;  %p1452_p12 = scmp.lt.s32.totalorder %s1703_s24, %s1703_s24 }
  0x1e   :  { %p1448_p11 = scmp.ne.s32.totalorder %s1703_s24, %s1447_s28  ;;  %p1453_p13 = scmp.lt.s32.totalorder %s1447_s28, %s1447_s28 }
  0x20   :  { %p1454_p0 = por %p1453_p13, %p1452_p12 }
  0x22   :  { %p1455_p1 = pnand %p1454_p0, %p1448_p11 }
  0x24   :  { %1458 = shalt.err (!%p1455_p1)
}
  0x25   :  { %70 = dma.hbm_to_vmem [thread:$0]  %s2043_s3, 256, %s1703_s24, [#allocation9], %s1627_s15, %s1627_s15, %s1628_s16  }
  0x26   :  { %s1629_s29 = smov [#allocation11]   ;;  %s1630_s13 = smov [#allocation2]  }
  0x27   :  { %s92_s30 = sshll.u32 %s1629_s29, 4  ;;  %s28_s14 = sshll.u32 %s1630_s13, 4  ;;  %s93_s30 = int_to_ptr.vmem [resolvable:$true] %s92_s30  ;;  %s1740_s14 = int_to_ptr.vmem [resolvable:$true] %s28_s14 }
  0x28   :  { %s1459_s19 = scalar_lea.hbm %s2047_s7, 256 }
  0x29   :  { %p1460_p2 = scmp.ne.s32.totalorder %s2047_s7, %s1459_s19  ;;  %p1463_p3 = scmp.lt.u32.totalorder %s1459_s19, %s2047_s7 }
  0x2b   :  { %p1465_p4 = pnand %p1463_p3, %p1460_p2 }
  0x2d   :  { %1468 = shalt.err (!%p1465_p4)
}
  0x2e   :  { %s1469_s3 = scalar_lea.vmem %s93_s30, 256  ;;  %p1474_p6 = scmp.lt.s32.totalorder %s93_s30, %s93_s30 }
  0x2f   :  { %p1470_p5 = scmp.ne.s32.totalorder %s93_s30, %s1469_s3  ;;  %p1475_p7 = scmp.lt.s32.totalorder %s1469_s3, %s1469_s3 }
  0x31   :  { %p1476_p8 = por %p1475_p7, %p1474_p6 }
  0x33   :  { %p1477_p9 = pnand %p1476_p8, %p1470_p5 }
  0x35   :  { %1480 = shalt.err (!%p1477_p9)
}
  0x36   :  { %98 = dma.hbm_to_vmem [thread:$0]  %s2047_s7, 256, %s93_s30, [#allocation12], %s1627_s15, %s1627_s15, %s1628_s16  }
  0x37   :  { %s1481_s1 = scalar_lea.hbm %s2040_s0, 256 }
  0x38   :  { %p1482_p10 = scmp.ne.s32.totalorder %s2040_s0, %s1481_s1  ;;  %p1485_p11 = scmp.lt.u32.totalorder %s1481_s1, %s2040_s0 }
  0x3a   :  { %p1487_p12 = pnand %p1485_p11, %p1482_p10 }
  0x3c   :  { %1490 = shalt.err (!%p1487_p12)
}
  0x3d   :  { %s1491_s18 = scalar_lea.vmem %s1740_s14, 256  ;;  %p1496_p0 = scmp.lt.s32.totalorder %s1740_s14, %s1740_s14 }
  0x3e   :  { %p1492_p13 = scmp.ne.s32.totalorder %s1740_s14, %s1491_s18  ;;  %p1497_p1 = scmp.lt.s32.totalorder %s1491_s18, %s1491_s18 }
  0x40   :  { %p1498_p2 = por %p1497_p1, %p1496_p0 }
  0x42   :  { %p1499_p3 = pnand %p1498_p2, %p1492_p13 }
  0x44   :  { %1502 = shalt.err (!%p1499_p3)
}
  0x45   :  { %34 = dma.hbm_to_vmem [thread:$0]  %s2040_s0, 256, %s1740_s14, [#allocation3], %s1627_s15, %s1627_s15, %s1628_s16  }
  0x46   :  { %s1631_s19 = smov [#allocation7]   ;;  %s1632_s21 = smov [#allocation10]  }
  0x47   :  { %s52_s20 = sshll.u32 %s1631_s19, 4  ;;  %s78_s23 = sshll.u32 %s1632_s21, 4  ;;  %s53_s20 = int_to_ptr.vmem [resolvable:$true] %s52_s20  ;;  %s1777_s23 = int_to_ptr.vmem [resolvable:$true] %s78_s23 }
  0x48   :  { %s1503_s24 = scalar_lea.hbm %s2042_s2, 256 }
  0x49   :  { %p1504_p4 = scmp.ne.s32.totalorder %s2042_s2, %s1503_s24  ;;  %p1507_p5 = scmp.lt.u32.totalorder %s1503_s24, %s2042_s2 }
  0x4b   :  { %p1509_p6 = pnand %p1507_p5, %p1504_p4 }
  0x4d   :  { %1512 = shalt.err (!%p1509_p6)
}
  0x4e   :  { %s1513_s0 = scalar_lea.vmem %s53_s20, 256  ;;  %p1518_p8 = scmp.lt.s32.totalorder %s53_s20, %s53_s20 }
  0x4f   :  { %p1514_p7 = scmp.ne.s32.totalorder %s53_s20, %s1513_s0  ;;  %p1519_p9 = scmp.lt.s32.totalorder %s1513_s0, %s1513_s0 }
  0x51   :  { %p1520_p10 = por %p1519_p9, %p1518_p8 }
  0x53   :  { %p1521_p11 = pnand %p1520_p10, %p1514_p7 }
  0x55   :  { %1524 = shalt.err (!%p1521_p11)
}
  0x56   :  { %58 = dma.hbm_to_vmem [thread:$0]  %s2042_s2, 256, %s53_s20, [#allocation6], %s1627_s15, %s1627_s15, %s1628_s16  }
  0x57   :  { %s1525_s17 = scalar_lea.hbm %s2045_s5, 256 }
  0x58   :  { %p1526_p12 = scmp.ne.s32.totalorder %s2045_s5, %s1525_s17  ;;  %p1529_p13 = scmp.lt.u32.totalorder %s1525_s17, %s2045_s5 }
  0x5a   :  { %p1531_p0 = pnand %p1529_p13, %p1526_p12 }
  0x5c   :  { %1534 = shalt.err (!%p1531_p0)
}
  0x5d   :  { %s1535_s21 = scalar_lea.vmem %s1777_s23, 256  ;;  %p1540_p2 = scmp.lt.s32.totalorder %s1777_s23, %s1777_s23 }
  0x5e   :  { %p1536_p1 = scmp.ne.s32.totalorder %s1777_s23, %s1535_s21  ;;  %p1541_p3 = scmp.lt.s32.totalorder %s1535_s21, %s1535_s21 }
  0x60   :  { %p1542_p4 = por %p1541_p3, %p1540_p2 }
  0x62   :  { %p1543_p5 = pnand %p1542_p4, %p1536_p1 }
  0x64   :  { %1546 = shalt.err (!%p1543_p5)
}
  0x65   :  { %84 = dma.hbm_to_vmem [thread:$0]  %s2045_s5, 256, %s1777_s23, [#allocation9], %s1627_s15, %s1627_s15, %s1628_s16  }
  0x66   :  { %s1633_s25 = smov [#allocation13]   ;;  %s1634_s24 = smov [#allocation14]  }
  0x67   :  { %s105_s3 = sshll.u32 %s1633_s25, 4  ;;  %s118_s26 = sshll.u32 %s1634_s24, 4  ;;  %s106_s3 = int_to_ptr.vmem [resolvable:$true] %s105_s3  ;;  %s1814_s26 = int_to_ptr.vmem [resolvable:$true] %s118_s26 }
  0x68   :  { %s1547_s1 = scalar_lea.hbm %s2048_s8, 16 }
  0x69   :  { %p1548_p6 = scmp.ne.s32.totalorder %s2048_s8, %s1547_s1  ;;  %p1551_p7 = scmp.lt.u32.totalorder %s1547_s1, %s2048_s8 }
  0x6b   :  { %p1553_p8 = pnand %p1551_p7, %p1548_p6 }
  0x6d   :  { %1556 = shalt.err (!%p1553_p8)
}
  0x6e   :  { %s1557_s5 = scalar_lea.vmem %s106_s3, 16  ;;  %s1561_s23 = scalar_lea.vmem %s106_s3, 32 }
  0x6f   :  { %p1558_p9 = scmp.ne.s32.totalorder %s106_s3, %s1557_s5  ;;  %p1562_p10 = scmp.lt.s32.totalorder %s106_s3, %s106_s3 }
  0x70   :  { %p1563_p11 = scmp.lt.s32.totalorder %s1561_s23, %s1557_s5 }
  0x72   :  { %p1564_p12 = por %p1563_p11, %p1562_p10 }
  0x74   :  { %p1565_p13 = pnand %p1564_p12, %p1558_p9 }
  0x76   :  { %1568 = shalt.err (!%p1565_p13)
}
  0x77   :  { %108 = dma.hbm_to_vmem [thread:$0]  %s2048_s8, 16, %s106_s3, [#allocation12]  }
  0x78   :  { %s1569_s30 = scalar_lea.hbm %s2051_s11, 512 }
  0x79   :  { %p1570_p0 = scmp.ne.s32.totalorder %s2051_s11, %s1569_s30  ;;  %p1573_p1 = scmp.lt.u32.totalorder %s1569_s30, %s2051_s11 }
  0x7b   :  { %p1575_p2 = pnand %p1573_p1, %p1570_p0 }
  0x7d   :  { %1578 = shalt.err (!%p1575_p2)
}
  0x7e   :  { %s1579_s25 = scalar_lea.vmem %s1814_s26, 512  ;;  %p1584_p4 = scmp.lt.s32.totalorder %s1814_s26, %s1814_s26 }
  0x7f   :  { %p1580_p3 = scmp.ne.s32.totalorder %s1814_s26, %s1579_s25  ;;  %p1585_p5 = scmp.lt.s32.totalorder %s1579_s25, %s1579_s25 }
  0x81   :  { %p1586_p6 = por %p1585_p5, %p1584_p4 }
  0x83   :  { %p1587_p7 = pnand %p1586_p6, %p1580_p3 }
  0x85   :  { %1590 = shalt.err (!%p1587_p7)
}
  0x86   :  { %124 = dma.hbm_to_vmem [thread:$0]  %s2051_s11, 512, %s1814_s26, [#allocation15], %s1627_s15, %s1627_s15, %s1628_s16  }
  0x87   :  { %1613 = dma.done.wait [#allocation3], 256  }
  0x88   :  { %1614 = vsyncadd [#allocation3], 4294967040 }
  0x89   :  { %1615 = dma.done.wait [#allocation6], 512  }
  0x8a   :  { %1616 = vsyncadd [#allocation6], 4294966784 }
  0x8b   :  { %1617 = dma.done.wait [#allocation9], 512  }
  0x8c   :  { %1618 = vsyncadd [#allocation9], 4294966784 }
  0x8d   :  { %1619 = dma.done.wait [#allocation12], 272  }
  0x8e   :  { %1620 = vsyncadd [#allocation12], 4294967024 }
  0x8f   :  { %1621 = dma.done.wait [#allocation15], 512  }
  0x90   :  { %1622 = vsyncadd [#allocation15], 4294966784  ;;  %v1635_v0 = vmov 0.0   ;;  %vm1636_vm0 = vmmov 0   ;;  %v152_v1 = vld [vmem:[#allocation8] sm:$0xff]  ;;  %v153_v2 = vld [vmem:[#allocation8 + $0x8] sm:$0xff] }
  0x91   :  { %1229 = vmatprep.subr.bf16.mxu0 %v1635_v0  ;;  %1235 = vmatprep.subr.bf16.mxu1 %v1635_v0  ;;  %v222_v3 = vld [vmem:[#allocation10] sm:$0xff]  ;;  %v155_v4 = vpack.c.bf16 %v153_v2, %v152_v1  ;;  %v223_v5 = vld [vmem:[#allocation10 + $0x8] sm:$0xff]  ;;  %v220_v10 = vld [vmem:[#allocation5] sm:$0xff]  ;;  %vm163_vm1 = vcmask 130048   ;;  %vm350_vm2 = vcmask 261120   ;;  %vm837_vm3 = vcmask 64512  }
  0x92   :  { %1231 = vmatprep.mubr.msk.bf16.mxu0 %vm1636_vm0, %v1635_v0  ;;  %1237 = vmatprep.mubr.msk.bf16.mxu1 %vm1636_vm0, %v1635_v0  ;;  %v150_v6 = vld [vmem:[#allocation2] sm:$0xff]  ;;  %v151_v7 = vld [vmem:[#allocation2 + $0x8] sm:$0xff]  ;;  %v225_v8 = vpack.c.bf16 %v223_v5, %v222_v3  ;;  %v221_v11 = vld [vmem:[#allocation5 + $0x8] sm:$0xff]  ;;  %vm844_vm4 = vcmask 1043456   ;;  %s1637_s23 = smov [#allocation16]  }
  0x93   :  { %v154_v9 = vpack.c.bf16 %v151_v7, %v150_v6  ;;  %1230 = vmatpush3.bf16.msra.mxu0 %v155_v4  ;;  %v224_v12 = vpack.c.bf16 %v221_v11, %v220_v10  ;;  %v291_v13 = vld [vmem:[#allocation11] sm:$0xff]  ;;  %v292_v14 = vld [vmem:[#allocation11 + $0x8] sm:$0xff]  ;;  %v289_v16 = vld [vmem:[#allocation7] sm:$0xff]  ;;  %s1138_s13 = sshll.u32 %s1637_s23, 4  ;;  %s1139_s13 = int_to_ptr.vmem [resolvable:$true] %s1138_s13 }
  0x94   :  { %1236 = vmatpush3.bf16.msra.mxu1 %v225_v8  ;;  %1241 = vmatprep.subr.bf16.mxu0 %v1635_v0  ;;  %v294_v15 = vpack.c.bf16 %v292_v14, %v291_v13  ;;  %v290_v17 = vld [vmem:[#allocation7 + $0x8] sm:$0xff]  ;;  %v1863_v21 = vld [vmem:[#allocation14 + $0x10] sm:$0xff]  ;;  %v1865_v22 = vld [vmem:[#allocation14 + $0x18] sm:$0xff]  ;;  %s1591_s17 = scalar_lea.vmem %s1139_s13, 256  ;;  %p1596_p9 = scmp.lt.s32.totalorder %s1139_s13, %s1139_s13 }
  0x95   :  { %v1859_v18 = vld [vmem:[#allocation14] sm:$0xff]  ;;  %v293_v19 = vpack.c.bf16 %v290_v17, %v289_v16  ;;  %v1861_v20 = vld [vmem:[#allocation14 + $0x8] sm:$0xff]  ;;  %v1873_v24 = vpack.c.bf16 %v1865_v22, %v1863_v21  ;;  %v1154_v25 = vld [vmem:[%s2044_s4] ss:$0 sm:$0xff]  ;;  %p1592_p8 = scmp.ne.s32.totalorder %s1139_s13, %s1591_s17  ;;  %p1597_p10 = scmp.lt.s32.totalorder %s1591_s17, %s1591_s17 }
  0x96   :  { %1232 = vmatmul.mubr.msk.bf16.vlgmr.msra.gmra.mrb[0].mxu0 %vm163_vm1, %v154_v9  ;;  %v1869_v23 = vpack.c.bf16 %v1861_v20, %v1859_v18  ;;  %v1158_v26 = vld [vmem:[%s2046_s6] ss:$0 sm:$0xff] }
  0x97   :  { %1238 = vmatmul.mubr.msk.bf16.vlgmr.msra.gmra.mrb[0].mxu1 %vm163_vm1, %v224_v12  ;;  %1243 = vmatprep.mubr.msk.bf16.mxu0 %vm1636_vm0, %v1635_v0  ;;  %p1598_p11 = por %p1597_p10, %p1596_p9 }
  0x98   :  { %1242 = vmatpush3.bf16.msra.mxu0 %v294_v15  ;;  %1328 = vmatprep.subr.bf16.mxu1 %v1869_v23 }
  0x99   :  { %1336 = vmatprep.subr.bf16.mxu0 %v1869_v23  ;;  %1330 = vmatpush3.bf16.msra.mxu1 %v1869_v23  ;;  %p1599_p12 = pnand %p1598_p11, %p1592_p8 }
  0x9a   :  { %1332 = vmatprep.subr.bf16.mxu1 %v1873_v24 }
  0x9d   :  { %1334 = vmatpush3.bf16.msra.mxu1 %v1873_v24 }
  0x9e   :  { %1244 = vmatmul.mubr.msk.bf16.vlgmr.msra.gmra.mrb[4].mxu0 %vm163_vm1, %v293_v19  ;;  %1344 = vmatprep.subr.bf16.mxu1 %v1869_v23 }
  0x9f   :  { %1338 = vmatpush3.bf16.msra.mxu0 %v1869_v23 }
  0xa0   :  { %1340 = vmatprep.subr.bf16.mxu0 %v1873_v24 }
  0xa3   :  { %1342 = vmatpush3.bf16.msra.mxu0 %v1873_v24 }
  0xa4   :  { %1352 = vmatprep.subr.bf16.mxu0 %v1869_v23 }
 0x169   :  { %v201_v27 = vpop.f32.mrb[0].mxu0 }
 0x16a   :  { %v202_v28 = vadd.f32 %v1154_v25, %v201_v27  ;;  %v270_v29 = vpop.f32.mrb[0].mxu1  ;;  %v1233_v30 = vpop.f32.mrb[1].mxu0 }
 0x16b   :  { %v271_v31 = vadd.f32 %v1158_v26, %v270_v29  ;;  %v1239_v32 = vpop.f32.mrb[1].mxu1  ;;  %v204_v33 = vpop.f32.mrb[2].mxu0 }
 0x16c   :  { %v1156_v34 = vmul.f32 -1.442695, %v202_v28  ;;  %v205_v35 = vadd.f32 %v1154_v25, %v204_v33  ;;  %v273_v36 = vpop.f32.mrb[2].mxu1  ;;  %v1234_v37 = vpop.f32.mrb[3].mxu0 }
 0x16d   :  { %v1160_v38 = vmul.f32 -1.442695, %v271_v31  ;;  %v274_v39 = vadd.f32 %v1158_v26, %v273_v36  ;;  %v1240_v40 = vpop.f32.mrb[3].mxu1 }
 0x16e   :  { %1375 = vpow2.f32 %v1156_v34  ;;  %v1157_v41 = vmul.f32 -1.442695, %v205_v35 }
 0x16f   :  { %1377 = vpow2.f32 %v1160_v38  ;;  %v1161_v42 = vmul.f32 -1.442695, %v274_v39 }
 0x170   :  { %1379 = vpow2.f32 %v1157_v41 }
 0x171   :  { %1381 = vpow2.f32 %v1161_v42  ;;  %v1938_v40 = vpop.f32.mrb[4].mxu0 }
 0x172   :  { %v1245_v41 = vpop.f32.mrb[5].mxu0 }
 0x173   :  { %v1940_v42 = vpop.f32.mrb[6].mxu0 }
 0x178   :  { %v1376_v43 = vpop.eup %1375 }
 0x179   :  { %v1378_v44 = vpop.eup %1377  ;;  %v214_v45 = vadd.f32 1.0, %v1376_v43  ;;  %v1246_v43 = vpop.f32.mrb[7].mxu0 }
 0x17a   :  { %v1380_v46 = vpop.eup %1379  ;;  %v283_v47 = vadd.f32 1.0, %v1378_v44 }
 0x17b   :  { %v1382_v48 = vpop.eup %1381  ;;  %1383 = vrcp.f32 %v214_v45  ;;  %v215_v49 = vadd.f32 1.0, %v1380_v46 }
 0x17c   :  { %1385 = vrcp.f32 %v283_v47  ;;  %v284_v50 = vadd.f32 1.0, %v1382_v48 }
 0x17d   :  { %1387 = vrcp.f32 %v215_v49 }
 0x17e   :  { %1389 = vrcp.f32 %v284_v50 }
 0x185   :  { %v1892_v51 = vpop.eup %1383 }
 0x186   :  { %v1894_v52 = vpop.eup %1385  ;;  %v365_v53 = vsel %vm350_vm2, %v1892_v51, 0.0  ;;  %v1913_v25 = vadd.f32 0.0005, %v1892_v51 }
 0x187   :  { %v1898_v54 = vpop.eup %1387  ;;  %v817_v55 = vpack.c.bf16 %v1894_v52, %v1894_v52  ;;  %v351_v56 = vsel %vm350_vm2, %v1894_v52, 0.0  ;;  %v366_v57 = vrot.slane %v365_v53, 4  ;;  %v1916_v27 = vadd.f32 0.0005, %v1894_v52 }
 0x188   :  { %v1904_v58 = vpop.eup %1389  ;;  %v352_v59 = vrot.slane %v351_v56, 4  ;;  %v372_v60 = vsel %vm350_vm2, %v1898_v54, 0.0  ;;  %v1924_v36 = vadd.f32 0.0005, %v1898_v54 }
 0x189   :  { %821 = vxpose.xlu0.c.b16.start.end [1/1] (short) (narrow) %v817_v55, 32  ;;  %v367_v61 = vadd.f32 %v366_v57, %v365_v53  ;;  %v358_v62 = vsel %vm350_vm2, %v1904_v58, 0.0  ;;  %v373_v63 = vrot.slane %v372_v60, 4  ;;  %v818_v5 = vpack.c.bf16 %v1904_v58, %v1904_v58 }
 0x18a   :  { %v353_v1 = vadd.f32 %v352_v59, %v351_v56  ;;  %v359_v2 = vrot.slane %v358_v62, 4  ;;  %v1920_v33 = vadd.f32 0.0005, %v1904_v58 }
 0x18b   :  { %v368_v3 = vrot.slane %v367_v61, 2  ;;  %v374_v4 = vadd.f32 %v373_v63, %v372_v60 }
 0x18c   :  { %v354_v6 = vrot.slane %v353_v1, 2  ;;  %v360_v7 = vadd.f32 %v359_v2, %v358_v62 }
 0x18d   :  { %v369_v8 = vadd.f32 %v368_v3, %v367_v61  ;;  %v375_v9 = vrot.slane %v374_v4, 2 }
 0x18e   :  { %897 = vxpose.xlu0.c.b16.start.end [1/1] (short) (narrow) %v818_v5, 32  ;;  %v355_v10 = vadd.f32 %v354_v6, %v353_v1  ;;  %v361_v11 = vrot.slane %v360_v7, 2 }
 0x18f   :  { %v370_v12 = vrot.slane %v369_v8, 1  ;;  %v376_v13 = vadd.f32 %v375_v9, %v374_v4 }
 0x190   :  { %v356_v14 = vrot.slane %v355_v10, 1  ;;  %v362_v15 = vadd.f32 %v361_v11, %v360_v7 }
 0x191   :  { %v371_v16 = vadd.f32 %v370_v12, %v369_v8  ;;  %v377_v17 = vrot.slane %v376_v13, 1 }
 0x192   :  { %v357_v19 = vadd.f32 %v356_v14, %v355_v10  ;;  %v363_v26 = vrot.slane %v362_v15, 1 }
 0x193   :  { %v470_v28 = vadd.f32 0.0005, %v371_v16  ;;  %v378_v29 = vadd.f32 %v377_v17, %v376_v13 }
 0x194   :  { %v381_v30 = vadd.f32 0.0005, %v357_v19  ;;  %v364_v31 = vadd.f32 %v363_v26, %v362_v15 }
 0x195   :  { %v472_v32 = vmul.f32 %v470_v28, %v1916_v27  ;;  %v471_v34 = vadd.f32 0.0005, %v378_v29 }
 0x196   :  { %v383_v35 = vmul.f32 %v381_v30, %v1913_v25  ;;  %v382_v37 = vadd.f32 0.0005, %v364_v31 }
 0x197   :  { %1266 = vmatprep.mubr.msk.f32.mxu0 %vm350_vm2, %v472_v32  ;;  %v473_v38 = vmul.f32 %v471_v34, %v1920_v33 }
 0x198   :  { %1255 = vmatprep.mubr.msk.f32.mxu1 %vm350_vm2, %v383_v35  ;;  %v384_v39 = vmul.f32 %v382_v37, %v1924_v36 }
 0x199   :  { %1267 = vmatmul.mubr.msk.f32.vlgmr.msra.gmra.mrb[8].mxu0 %vm350_vm2, %v473_v38 }
 0x19a   :  { %1256 = vmatmul.mubr.msk.f32.vlgmr.msra.gmra.mrb[4].mxu1 %vm350_vm2, %v384_v39  ;;  %1354 = vmatpush3.bf16.msra.mxu0 %v1869_v23 }
 0x19b   :  { %1346 = vmatpush3.bf16.msra.mxu1 %v1869_v23  ;;  %1356 = vmatprep.subr.bf16.mxu0 %v1873_v24 }
 0x19c   :  { %1348 = vmatprep.subr.bf16.mxu1 %v1873_v24 }
 0x19e   :  { %1358 = vmatpush3.bf16.msra.mxu0 %v1873_v24 }
 0x19f   :  { %1350 = vmatpush3.bf16.msra.mxu1 %v1873_v24 }
 0x1ef   :  { %v829_v37 = vpop.trf.xlu0 }
 0x1f3   :  { %v1965_v38 = vpop.trf.xlu0 }
 0x26c   :  { %v1268_v44 = vpop.f32.mrb[8].mxu0 }
 0x26d   :  { %v1257_v45 = vpop.f32.mrb[4].mxu1  ;;  %1391 = vrcp.f32 %v1268_v44  ;;  %v546_v46 = vpop.f32.mrb[9].mxu0 }
 0x26e   :  { %1393 = vrcp.f32 %v1257_v45  ;;  %v457_v23 = vpop.f32.mrb[5].mxu1 }
 0x26f   :  { %1395 = vrcp.f32 %v457_v23 }
 0x270   :  { %1397 = vrcp.f32 %v546_v46 }
 0x277   :  { %v1392_v47 = vpop.eup %1391 }
 0x278   :  { %v1394_v48 = vpop.eup %1393  ;;  %v558_v49 = vmul.f32 %v1392_v47, %v1904_v58 }
 0x279   :  { %v1396_v50 = vpop.eup %1395  ;;  %v1944_v24 = vmul.f32 %v1394_v48, %v1898_v54 }
 0x27a   :  { %v1398_v53 = vpop.eup %1397  ;;  %v566_v55 = vsel %vm350_vm2, %v558_v49, 0.0  ;;  %v1948_v56 = vmul.f32 %v1396_v50, %v1892_v51 }
 0x27b   :  { %v582_v57 = vsel %vm350_vm2, %v1944_v24, 0.0  ;;  %v567_v59 = vrot.slane %v566_v55, 4  ;;  %v557_v60 = vmul.f32 %v1398_v53, %v1894_v52 }
 0x27c   :  { %v583_v61 = vrot.slane %v582_v57, 4  ;;  %v575_v58 = vsel %vm350_vm2, %v1948_v56, 0.0 }
 0x27d   :  { %v568_v62 = vadd.f32 %v567_v59, %v566_v55  ;;  %v576_v63 = vrot.slane %v575_v58, 4  ;;  %v559_v54 = vsel %vm350_vm2, %v557_v60, 0.0 }
 0x27e   :  { %v584_v1 = vadd.f32 %v583_v61, %v582_v57  ;;  %v560_v2 = vrot.slane %v559_v54, 4 }
 0x27f   :  { %v569_v3 = vrot.slane %v568_v62, 2  ;;  %v577_v4 = vadd.f32 %v576_v63, %v575_v58 }
 0x280   :  { %v585_v51 = vrot.slane %v584_v1, 2  ;;  %v561_v5 = vadd.f32 %v560_v2, %v559_v54 }
 0x281   :  { %v578_v6 = vrot.slane %v577_v4, 2  ;;  %v570_v7 = vadd.f32 %v569_v3, %v568_v62 }
 0x282   :  { %v562_v8 = vrot.slane %v561_v5, 2  ;;  %v586_v9 = vadd.f32 %v585_v51, %v584_v1 }
 0x283   :  { %v579_v10 = vadd.f32 %v578_v6, %v577_v4  ;;  %v571_v52 = vrot.slane %v570_v7, 1 }
 0x284   :  { %v563_v11 = vadd.f32 %v562_v8, %v561_v5  ;;  %v587_v12 = vrot.slane %v586_v9, 1 }
 0x285   :  { %v580_v13 = vrot.slane %v579_v10, 1  ;;  %v572_v14 = vadd.f32 %v571_v52, %v570_v7 }
 0x286   :  { %v564_v15 = vrot.slane %v563_v11, 1  ;;  %v588_v16 = vadd.f32 %v587_v12, %v586_v9 }
 0x287   :  { %v581_v17 = vadd.f32 %v580_v13, %v579_v10  ;;  %v590_v29 = vadd.f32 0.0005, %v572_v14 }
 0x288   :  { %v565_v19 = vadd.f32 %v564_v15, %v563_v11  ;;  %v687_v26 = vadd.f32 0.0005, %v588_v16  ;;  %v1162_v16 = vld [vmem:[#allocation13] ss:$0 sm:$0xff] }
 0x289   :  { %v686_v28 = vadd.f32 0.0005, %v581_v17  ;;  %v592_v35 = vmul.f32 %v590_v29, %v1924_v36 }
 0x28a   :  { %v589_v30 = vadd.f32 0.0005, %v565_v19  ;;  %v689_v34 = vmul.f32 %v687_v26, %v1920_v33 }
 0x28b   :  { %v688_v31 = vmul.f32 %v686_v28, %v1916_v27  ;;  %v905_v27 = vpop.trf.xlu0  ;;  %v343_v28 = vadd.f32 %v1162_v16, %v1940_v42 }
 0x28c   :  { %v591_v32 = vmul.f32 %v589_v30, %v1913_v25  ;;  %v340_v30 = vadd.f32 %v1162_v16, %v1938_v40 }
 0x28d   :  { %1288 = vmatprep.mubr.msk.f32.mxu0 %vm350_vm2, %v688_v31 }
 0x28e   :  { %1277 = vmatprep.mubr.msk.f32.mxu1 %vm350_vm2, %v591_v32  ;;  %1289 = vmatmul.mubr.msk.f32.vlgmr.msra.gmra.mrb[10].mxu0 %vm350_vm2, %v689_v34 }
 0x28f   :  { %1278 = vmatmul.mubr.msk.f32.vlgmr.msra.gmra.mrb[6].mxu1 %vm350_vm2, %v592_v35  ;;  %1299 = vmatprep.mubr.msk.bf16.mxu0 %vm837_vm3, %v905_v27 }
 0x290   :  { %1293 = vmatprep.mubr.msk.bf16.mxu1 %vm837_vm3, %v829_v37 }
 0x361   :  { %v1290_v25 = vpop.f32.mrb[10].mxu0 }
 0x362   :  { %v1968_v33 = vpop.f32.mrb[6].mxu1  ;;  %v1175_v39 = vclamps-f32 %v1290_v25, 1.0  ;;  %v762_v36 = vpop.f32.mrb[11].mxu0 }
 0x363   :  { %v1970_v41 = vpop.f32.mrb[7].mxu1  ;;  %v1174_v43 = vclamps-f32 %v762_v36, 1.0 }
 0x364   :  { %v782_v44 = vsel %vm350_vm2, %v1175_v39, -inf }
 0x365   :  { %v783_v45 = vrot.slane %v782_v44, 4  ;;  %v775_v46 = vsel %vm350_vm2, %v1174_v43, -inf }
 0x366   :  { %v776_v23 = vrot.slane %v775_v46, 4 }
 0x367   :  { %v784_v47 = vmax.f32 %v782_v44, %v783_v45 }
 0x368   :  { %v777_v48 = vmax.f32 %v775_v46, %v776_v23 }
 0x369   :  { %v785_v49 = vrot.slane %v784_v47, 2 }
 0x36a   :  { %v778_v50 = vrot.slane %v777_v48, 2 }
 0x36b   :  { %v786_v53 = vmax.f32 %v784_v47, %v785_v49 }
 0x36c   :  { %v779_v55 = vmax.f32 %v777_v48, %v778_v50 }
 0x36d   :  { %v787_v57 = vrot.slane %v786_v53, 1 }
 0x36e   :  { %v780_v59 = vrot.slane %v779_v55, 1 }
 0x36f   :  { %v788_v60 = vmax.f32 %v786_v53, %v787_v57 }
 0x370   :  { %v781_v61 = vmax.f32 %v779_v55, %v780_v59 }
 0x371   :  { %v790_v58 = vsub.f32 %v1175_v39, %v788_v60  ;;  %v906_v39 = vpop.trf.xlu0 }
 0x372   :  { %v789_v62 = vsub.f32 %v1174_v43, %v781_v61 }
 0x373   :  { %v793_v63 = vmul.f32 1.442695, %v790_v58 }
 0x374   :  { %v791_v54 = vmul.f32 1.442695, %v789_v62  ;;  %v979_v62 = vpack.c.bf16 %v1948_v56, %v1948_v56  ;;  %v1076_v56 = vld [vmem:[%s2049_s9 + $0x18] sm:$0xff] }
 0x375   :  { %1399 = vpow2.f32 %v793_v63 }
 0x376   :  { %1401 = vpow2.f32 %v791_v54  ;;  %v1171_v54 = vmul.f32 -1.442695, %v1968_v33 }
 0x37f   :  { %v1400_v1 = vpop.eup %1399 }
 0x380   :  { %v1402_v2 = vpop.eup %1401  ;;  %v802_v3 = vsel %vm350_vm2, %v1400_v1, 0.0 }
 0x381   :  { %v803_v4 = vrot.slane %v802_v3, 4  ;;  %v795_v51 = vsel %vm350_vm2, %v1402_v2, 0.0 }
 0x382   :  { %v796_v5 = vrot.slane %v795_v51, 4 }
 0x383   :  { %v804_v6 = vadd.f32 %v803_v4, %v802_v3 }
 0x384   :  { %v797_v7 = vadd.f32 %v796_v5, %v795_v51 }
 0x385   :  { %v805_v8 = vrot.slane %v804_v6, 2 }
 0x386   :  { %v798_v9 = vrot.slane %v797_v7, 2 }
 0x387   :  { %v806_v10 = vadd.f32 %v805_v8, %v804_v6 }
 0x388   :  { %v799_v52 = vadd.f32 %v798_v9, %v797_v7 }
 0x389   :  { %v807_v11 = vrot.slane %v806_v10, 1 }
 0x38a   :  { %v800_v12 = vrot.slane %v799_v52, 1 }
 0x38b   :  { %v808_v13 = vadd.f32 %v807_v11, %v806_v10 }
 0x38c   :  { %v801_v14 = vadd.f32 %v800_v12, %v799_v52 }
 0x38d   :  { %1403 = vrcp.f32 %v808_v13 }
 0x38e   :  { %1405 = vrcp.f32 %v801_v14  ;;  %v1182_v14 = vld [vmem:[%s2050_s10] ss:$0 sm:$0xff] }
 0x38f   :  { %1407 = vpow2.f32 %v1171_v54 }
 0x397   :  { %v1404_v15 = vpop.eup %1403 }
 0x398   :  { %v1406_v17 = vpop.eup %1405  ;;  %v812_v19 = vmul.f32 %v1404_v15, %v1400_v1  ;;  %v1170_v1 = vmul.f32 -1.442695, %v1970_v41 }
 0x399   :  { %v811_v26 = vmul.f32 %v1406_v17, %v1402_v2  ;;  %v1408_v2 = vpop.eup %1407 }
 0x39a   :  { %v814_v29 = vmul.f32 8.0, %v812_v19  ;;  %1409 = vpow2.f32 %v1170_v1  ;;  %v681_v4 = vadd.f32 1.0, %v1408_v2 }
 0x39b   :  { %v813_v31 = vmul.f32 8.0, %v811_v26 }
 0x39c   :  { %v816_v32 = vmul.f32 %v814_v29, %v343_v28  ;;  %1411 = vrcp.f32 %v681_v4 }
 0x39d   :  { %v815_v34 = vmul.f32 %v813_v31, %v340_v30 }
 0x39e   :  { %v820_v35 = vpack.c.bf16 %v816_v32, %v816_v32 }
 0x39f   :  { %v819_v37 = vpack.c.bf16 %v815_v34, %v815_v34 }
 0x3a0   :  { %1360 = vmatprep.subr.msk.bf16.mxu0 %vm844_vm4, %v820_v35  ;;  %v920_v27 = vsel %vm844_vm4, %v820_v35, 0 }
 0x3a1   :  { %1359 = vmatprep.subr.msk.bf16.mxu1 %vm844_vm4, %v819_v37  ;;  %1298 = vmatpush3.bf16.msra.mxu0 %v920_v27  ;;  %v846_v25 = vsel %vm844_vm4, %v819_v37, 0 }
 0x3a2   :  { %1292 = vmatpush3.bf16.msra.mxu1 %v846_v25  ;;  %1311 = vmatprep.subr.bf16.mxu0 %v1635_v0 }
 0x3a3   :  { %1303 = vmatprep.subr.bf16.mxu1 %v1635_v0 }
 0x3a4   :  { %1300 = vmatmul.mubr.msk.bf16.vlgmr.msra.gmra.mrb[12].mxu0 %vm837_vm3, %v906_v39  ;;  %v1410_v3 = vpop.eup %1409 }
 0x3a5   :  { %1294 = vmatmul.mubr.msk.bf16.vlgmr.msra.gmra.mrb[8].mxu1 %vm837_vm3, %v1965_v38  ;;  %1315 = vmatprep.mubr.msk.bf16.mxu0 %vm1636_vm0, %v1635_v0 }
 0x3a6   :  { %1307 = vmatprep.mubr.msk.bf16.mxu1 %vm1636_vm0, %v1635_v0  ;;  %v1412_v51 = vpop.eup %1411 }
 0x477   :  { %v1301_v40 = vpop.f32.mrb[12].mxu0 }
 0x478   :  { %v977_v42 = vmul.f32 %v1301_v40, %v1863_v21  ;;  %v1295_v36 = vpop.f32.mrb[8].mxu1  ;;  %v956_v43 = vpop.f32.mrb[13].mxu0 }
 0x479   :  { %v882_v44 = vpop.f32.mrb[9].mxu1  ;;  %v1302_v45 = vpop.f32.mrb[14].mxu0  ;;  %v973_v48 = vmul.f32 %v1295_v36, %v1863_v21  ;;  %v975_v38 = vmul.f32 %v956_v43, %v1859_v18  ;;  %v1073_v21 = vld [vmem:[%s2049_s9] sm:$0xff] }
 0x47a   :  { %v978_v46 = vmul.f32 %v1302_v45, %v1865_v22  ;;  %v1296_v23 = vpop.f32.mrb[10].mxu1  ;;  %v959_v47 = vpop.f32.mrb[15].mxu0  ;;  %v971_v55 = vmul.f32 %v882_v44, %v1859_v18  ;;  %v1074_v18 = vld [vmem:[%s2049_s9 + $0x8] sm:$0xff] }
 0x47b   :  { %v974_v49 = vmul.f32 %v1296_v23, %v1865_v22  ;;  %v976_v50 = vmul.f32 %v959_v47, %v1861_v20  ;;  %v885_v53 = vpop.f32.mrb[11].mxu1  ;;  %v1078_v22 = vpack.c.bf16 %v1074_v18, %v1073_v21 }
 0x47c   :  { %v984_v57 = vpack.c.bf16 %v978_v46, %v977_v42  ;;  %v972_v59 = vmul.f32 %v885_v53, %v1861_v20  ;;  %v980_v20 = vpack.c.bf16 %v1944_v24, %v1944_v24  ;;  %v1075_v24 = vld [vmem:[%s2049_s9 + $0x10] sm:$0xff] }
 0x47d   :  { %v982_v60 = vpack.c.bf16 %v974_v49, %v973_v48  ;;  %v983_v61 = vpack.c.bf16 %v976_v50, %v975_v38  ;;  %v1079_v63 = vpack.c.bf16 %v1076_v56, %v1075_v24 }
 0x47e   :  { %v981_v58 = vpack.c.bf16 %v972_v59, %v971_v55 }
 0x47f   :  { %1312 = vmatpush3.bf16.msra.mxu0 %v983_v61 }
 0x480   :  { %1304 = vmatpush3.bf16.msra.mxu1 %v981_v58  ;;  %1313 = vmatprep.subr.bf16.mxu0 %v1635_v0 }
 0x481   :  { %1305 = vmatprep.subr.bf16.mxu1 %v1635_v0 }
 0x483   :  { %1314 = vmatpush3.bf16.msra.mxu0 %v984_v57 }
 0x484   :  { %1306 = vmatpush3.bf16.msra.mxu1 %v982_v60 }
 0x485   :  { %1319 = vmatprep.subr.bf16.mxu1 %v1635_v0 }
 0x486   :  { %1316 = vmatmul.mubr.msk.bf16.vlgmr.msra.gmra.mrb[16].mxu0 %vm350_vm2, %v980_v20 }
 0x487   :  { %1308 = vmatmul.mubr.msk.bf16.vlgmr.msra.gmra.mrb[12].mxu1 %vm350_vm2, %v979_v62 }
 0x488   :  { %1320 = vmatpush3.bf16.msra.mxu1 %v1078_v22  ;;  %1323 = vmatprep.mubr.msk.bf16.mxu1 %vm1636_vm0, %v1635_v0 }
 0x489   :  { %1321 = vmatprep.subr.bf16.mxu1 %v1635_v0  ;;  %v680_v0 = vadd.f32 1.0, %v1410_v3 }
 0x48b   :  { %1413 = vrcp.f32 %v680_v0 }
 0x48c   :  { %1322 = vmatpush3.bf16.msra.mxu1 %v1079_v63 }
 0x495   :  { %v1414_v6 = vpop.eup %1413 }
 0x559   :  { %v1065_v5 = vpop.f32.mrb[16].mxu0 }
 0x55a   :  { %v1072_v7 = vmul.f32 %v1412_v51, %v1065_v5  ;;  %v1022_v8 = vpop.f32.mrb[12].mxu1  ;;  %v1317_v9 = vpop.f32.mrb[17].mxu0 }
 0x55b   :  { %v1071_v10 = vmul.f32 %v1414_v6, %v1022_v8  ;;  %v1309_v52 = vpop.f32.mrb[13].mxu1  ;;  %v1068_v11 = vpop.f32.mrb[18].mxu0 }
 0x55c   :  { %v1025_v33 = vpop.f32.mrb[14].mxu1  ;;  %v1318_v12 = vpop.f32.mrb[19].mxu0 }
 0x55d   :  { %v1077_v41 = vpack.c.bf16 %v1072_v7, %v1071_v10  ;;  %v1310_v13 = vpop.f32.mrb[15].mxu1 }
 0x55f   :  { %1324 = vmatmul.mubr.msk.bf16.vlgmr.msra.gmra.mrb[16].mxu1 %vm350_vm2, %v1077_v41 }
 0x632   :  { %v1124_v15 = vpop.f32.mrb[16].mxu1 }
 0x633   :  { %v1125_v16 = vadd.f32 %v1182_v14, %v1124_v15  ;;  %v1325_v17 = vpop.f32.mrb[17].mxu1 }
 0x634   :  { %v1127_v19 = vpop.f32.mrb[18].mxu1 }
 0x635   :  { %1131 = vst [vmem:[#allocation16] sm:$0xff] %v1125_v16  ;;  %v1128_v26 = vadd.f32 %v1182_v14, %v1127_v19  ;;  %v1326_v28 = vpop.f32.mrb[19].mxu1 }
 0x637   :  { %1132 = vst [vmem:[#allocation16 + $0x8] sm:$0xff] %v1128_v26 }
 0x638   :  { %1602 = shalt.err (!%p1599_p12)
}
 0x639   :  { %s1603_s7 = scalar_lea.hbm %s2052_s12, 256 }
 0x63a   :  { %p1604_p13 = scmp.ne.s32.totalorder %s2052_s12, %s1603_s7  ;;  %p1607_p0 = scmp.lt.u32.totalorder %s1603_s7, %s2052_s12 }
 0x63c   :  { %p1609_p1 = pnand %p1607_p0, %p1604_p13 }
 0x63e   :  { %1612 = shalt.err (!%p1609_p1)
}
 0x63f   :  { %1144 = dma.vmem_to_hbm [thread:$0]  %s1139_s13, 256, %s2052_s12, [#allocation4], %s1627_s15, %s1627_s15, %s1628_s16  }
 0x640   :  { %1623 = dma.done.wait [#allocation4], 256  }
 0x641   :  { %1624 = vsyncadd [#allocation4], 4294967040 }
 0x642   :  { %1148 = vsyncpa [#allocation3], 1 }
 0x643   :  { %1149 = vsyncpa [#allocation6], 1 }
 0x644   :  { %1150 = vsyncpa [#allocation9], 1 }
 0x645   :  { %1151 = vsyncpa [#allocation12], 1 }
 0x646   :  { %1152 = vsyncpa [#allocation15], 1 }
 0x647   :  { %1153 = vsyncpa [#allocation4], 1 }

</bundles_post_ra>
